<compile_context>
chip_gen: v7x
topology: tpu7x:2x2x1
jax: 0.10.0
libtpu: 0.0.40
codegen_flags: <defaults>
</compile_context>

<pallas_src>
import jax
import jax.numpy as jnp
from jax.experimental import pallas as pl
from jax.experimental.pallas import tpu as pltpu

CHAR_EMBED = 50
KERNEL = 5
PAD = 1
NEG_BIG = -1e30   # finite "minus infinity": 0 * NEG_BIG == 0 (no NaNs on the MXU)


def _embed_cnn_highway_kernel(ids_ref, tabs_ref, bc_ref, wh_ref, bh_ref, o_ref):
    tn, mword_pp = ids_ref.shape
    kvp, e = tabs_ref.shape                 # kvp = KERNEL * v_pad
    v_pad = kvp // KERNEL
    lout_p = mword_pp - KERNEL + 1          # multiple of 16 (wrapper guarantees)

    ids = ids_ref[...]                      # (tn, mword_pp) int32
    ids3 = ids[:, :, None]                  # one small relayout, reused by all taps

    # Per-tap one-hot blocks over the (padded) char vocab; each block is
    # exactly v_pad = 128*m lanes wide, so the concat is lane-tile aligned.
    viota = jax.lax.broadcasted_iota(jnp.int32, (tn, lout_p, v_pad), 2)
    taps = [
        (ids3[:, k:k + lout_p, :] == viota).astype(jnp.bfloat16)
        for k in range(KERNEL)
    ]
    slab = jnp.concatenate(taps, axis=-1)   # (tn, lout_p, K*v_pad) bf16

    # Embedding lookup + Conv1d in ONE matmul:
    #   tabs[k*v_pad + v, :] = embed[v, :] @ w_conv[:, :, k].T
    # lout_p % 16 == 0  ->  the reshape is a free relabeling (no repack).
    conv = jnp.dot(slab.reshape(tn * lout_p, kvp), tabs_ref[...],
                   preferred_element_type=jnp.float32)       # (tn*lout_p, E) f32

    # Max-over-time, then bias + ReLU (hoisted past the pool; exact since both
    # are monotone).  Padded time-steps carry a -1e30 table contribution and
    # can never win the max.
    pooled = jnp.max(conv.reshape(tn, lout_p, e), axis=1)    # (tn, E)
    h = jnp.maximum(pooled + bc_ref[...], 0.0)

    # Highway: proj & gate fused into one bf16 (E, 2E) matmul, f32 epilogue.
    hw = jnp.dot(h.astype(jnp.bfloat16), wh_ref[...],
                 preferred_element_type=jnp.float32) + bh_ref[...]
    proj = jnp.maximum(hw[:, :e], 0.0)
    gate = jax.nn.sigmoid(hw[:, e:])
    o_ref[...] = gate * proj + (1.0 - gate) * h


def _round_up(x, m):
    return ((x + m - 1) // m) * m


def _tiling_for_device(n):
    """Pick (tile_n, ntiles, vmem_limit) per TPU generation."""
    try:
        vmem_phys = pltpu.get_tpu_info().vmem_capacity_bytes
    except Exception:                       # unknown backend -> conservative
        vmem_phys = 64 * 1024 * 1024
    if vmem_phys >= 96 * 1024 * 1024:       # v5e / v6e: 128 MiB physical VMEM
        tile_max, vmem_limit = 512, 96 * 1024 * 1024
    else:                                   # v7x-class: 64 MiB per TensorCore
        tile_max, vmem_limit = 256, 52 * 1024 * 1024

    # >= 2 tiles whenever possible so both v7x TensorCores get work; nudge the
    # tile count even so neither core idles on a tail tile.
    tile_n = min(tile_max, max(8, _round_up((n + 1) // 2, 8)))
    ntiles = pl.cdiv(n, tile_n)
    if ntiles >= 3 and ntiles % 2 == 1:
        tile_n = max(8, _round_up(pl.cdiv(n, ntiles + 1), 8))
        ntiles = pl.cdiv(n, tile_n)
    return tile_n, ntiles, vmem_limit


def model_embeddings_forward(input_ids, params):
    """input_ids: (l, b, mword) int32. Returns (l, b, word_embed_size) float32."""
    l, b, mword = input_ids.shape
    n = l * b
    vocab = params["embed"].shape[0]
    e = params["w_conv"].shape[0]

    lout = mword + 2 * PAD - KERNEL + 1          # true conv output length
    lout_p = _round_up(max(lout, 1), 16)         # 16 -> free bf16 reshapes
    mword_pp = lout_p + KERNEL - 1
    v_pad = _round_up(vocab + 2, 128)            # +2 sentinel rows, lane-aligned
    zero_id, ninf_id = vocab, vocab + 1

    # ---- weight folding (tiny, done once) ----------------------------------
    # Fused embedding+conv tables: tabs[k, v, :] = embed[v, :] @ w_conv[:, :, k].T
    w_taps = jnp.transpose(params["w_conv"], (2, 1, 0))           # (K, C, E)
    tabs = jnp.einsum("vc,kce->kve", params["embed"], w_taps)     # (K, V, E) f32
    tabs = jnp.pad(tabs, ((0, 0), (0, v_pad - vocab), (0, 0)))    # rows >= V -> 0
    tabs = tabs.at[:, ninf_id, :].set(NEG_BIG)                    # time-pad sentinel
    tabs = tabs.reshape(KERNEL * v_pad, e).astype(jnp.bfloat16)

    w_hwy = jnp.concatenate([params["w_proj"].T, params["w_gate"].T],
                            axis=1).astype(jnp.bfloat16)          # (E, 2E)
    b_hwy = jnp.concatenate([params["b_proj"], params["b_gate"]]).reshape(1, 2 * e)
    b_conv = params["b_conv"].reshape(1, e)

    # ---- id stream: conv zero-pad + time-pad via sentinel ids (int32 only) --
    ids = input_ids.reshape(n, mword).astype(jnp.int32)
    ids_p = jnp.concatenate(
        [jnp.full((n, PAD), zero_id, jnp.int32),
         ids,
         jnp.full((n, PAD), zero_id, jnp.int32),
         jnp.full((n, mword_pp - mword - 2 * PAD), ninf_id, jnp.int32)],
        axis=1)                                                   # (n, mword_pp)

    tile_n, ntiles, vmem_limit = _tiling_for_device(n)
    n_pad = ntiles * tile_n
    if n_pad != n:
        ids_p = jnp.pad(ids_p, ((0, n_pad - n), (0, 0)), constant_values=zero_id)

    out = pl.pallas_call(
        _embed_cnn_highway_kernel,
        out_shape=jax.ShapeDtypeStruct((n_pad, e), jnp.float32),
        grid_spec=pltpu.PrefetchScalarGridSpec(
            num_scalar_prefetch=0,
            grid=(ntiles,),
            in_specs=[
                pl.BlockSpec((tile_n, mword_pp), lambda i: (i, 0)),
                pl.BlockSpec((KERNEL * v_pad, e), lambda i: (0, 0)),
                pl.BlockSpec((1, e), lambda i: (0, 0)),
                pl.BlockSpec((e, 2 * e), lambda i: (0, 0)),
                pl.BlockSpec((1, 2 * e), lambda i: (0, 0)),
            ],
            out_specs=pl.BlockSpec((tile_n, e), lambda i: (i, 0)),
        ),
        compiler_params=pltpu.CompilerParams(
            dimension_semantics=("parallel",),
            vmem_limit_bytes=vmem_limit),
    )(ids_p, tabs, b_conv, w_hwy, b_hwy)

    # TODO(synk): nn.Dropout(p=0.3) is identity in eval mode; training-mode
    #             dropout would need pltpu.prng_seed / prng_random_bits.
    return out[:n].reshape(l, b, e)


def make_params(key, vocab_size, word_embed_size):
    ks = jax.random.split(key, 7)
    s = 0.1
    return {
        "embed":  jax.random.normal(ks[0], (vocab_size, CHAR_EMBED), jnp.float32) * s,
        "w_conv": jax.random.normal(ks[1], (word_embed_size, CHAR_EMBED, KERNEL),
                                    jnp.float32) * s,
        "b_conv": jax.random.normal(ks[2], (word_embed_size,), jnp.float32) * s,
        "w_proj": jax.random.normal(ks[3], (word_embed_size, word_embed_size),
                                    jnp.float32) * s,
        "b_proj": jax.random.normal(ks[4], (word_embed_size,), jnp.float32) * s,
        "w_gate": jax.random.normal(ks[5], (word_embed_size, word_embed_size),
                                    jnp.float32) * s,
        "b_gate": jax.random.normal(ks[6], (word_embed_size,), jnp.float32) * s,
    }


def reference_forward(input_ids, params):
    """Pure-JAX f32 reference matching the PyTorch module (eval mode)."""
    l, b, mword = input_ids.shape
    n = l * b
    emb = params["embed"][input_ids.reshape(n, mword)]        # (N, mword, 50)
    x = jnp.transpose(emb, (0, 2, 1))                         # NCW
    conv = jax.lax.conv_general_dilated(
        x, params["w_conv"], window_strides=(1,), padding=[(PAD, PAD)],
        dimension_numbers=("NCH", "OIH", "NCH"))
    conv = conv + params["b_conv"][None, :, None]
    h = jnp.max(jax.nn.relu(conv), axis=2)                    # (N, E)
    proj = jax.nn.relu(h @ params["w_proj"].T + params["b_proj"])
    gate = jax.nn.sigmoid(h @ params["w_gate"].T + params["b_gate"])
    out = gate * proj + (1.0 - gate) * h
    return out.reshape(l, b, -1)


if __name__ == "__main__":
    sentence_length, batch_size, max_word_length = 4, 2, 12
    word_embed_size = 32
    char_vocab_size = 30

    key = jax.random.PRNGKey(0)
    k_ids, k_params = jax.random.split(key)
    params = make_params(k_params, char_vocab_size, word_embed_size)
    input_ids = jax.random.randint(
        k_ids, (sentence_length, batch_size, max_word_length),
        0, char_vocab_size, dtype=jnp.int32)

    out = jax.block_until_ready(model_embeddings_forward(input_ids, params))
    ref = jax.block_until_ready(reference_forward(input_ids, params))

    assert out.shape == (sentence_length, batch_size, word_embed_size)
    max_err = float(jnp.max(jnp.abs(out - ref)))
    # bf16 tables / highway weights (f32 MXU accumulation) -> ~1e-3 deviation
    # from the pure-f32 reference; 1e-2 gives ample margin.
    assert jnp.allclose(out, ref, atol=1e-2, rtol=1e-2), max_err

    print("KERNEL_OK")
</pallas_src>

<mosaic_0001>
module attributes {stable_mosaic.version = 11 : i64} {
  func.func @_embed_cnn_highway_kernel(%arg0: i32, %arg1: memref<8x20xi32, #tpu.memory_space<vmem>>, %arg2: memref<640x32xbf16, #tpu.memory_space<vmem>>, %arg3: memref<1x32xf32, #tpu.memory_space<vmem>>, %arg4: memref<32x64xbf16, #tpu.memory_space<vmem>>, %arg5: memref<1x64xf32, #tpu.memory_space<vmem>>, %arg6: memref<8x32xf32, #tpu.memory_space<vmem>>) attributes {dimension_semantics = [#tpu.dimension_semantics<parallel>], iteration_bounds = array<i64: 1>, scalar_prefetch = 0 : i64, scratch_operands = 0 : i64, tpu.core_type = #tpu.core_type<tc>, window_params = [{transform_indices = @transform_0, window_bounds = array<i64: 8, 20>}, {pipeline_mode = #tpu.pipeline_mode<synchronous>, transform_indices = @transform_1, window_bounds = array<i64: 640, 32>}, {pipeline_mode = #tpu.pipeline_mode<synchronous>, transform_indices = @transform_2, window_bounds = array<i64: 1, 32>}, {pipeline_mode = #tpu.pipeline_mode<synchronous>, transform_indices = @transform_3, window_bounds = array<i64: 32, 64>}, {pipeline_mode = #tpu.pipeline_mode<synchronous>, transform_indices = @transform_4, window_bounds = array<i64: 1, 64>}, {transform_indices = @transform_5, window_bounds = array<i64: 8, 32>}]} {
    %c0 = arith.constant 0 : index
    %c0_0 = arith.constant 0 : index
    %0 = vector.load %arg1[%c0, %c0_0] : memref<8x20xi32, #tpu.memory_space<vmem>>, vector<8x20xi32>
    %1 = vector.shape_cast %0 : vector<8x20xi32> to vector<8x20x1xi32>
    %2 = tpu.iota {dimensions = array<i32: 2>} : vector<8x16x128xi32>
    %3 = vector.extract_strided_slice %1 {offsets = [0, 0, 0], sizes = [8, 16, 1], strides = [1, 1, 1]} : vector<8x20x1xi32> to vector<8x16x1xi32>
    %4 = vector.broadcast %3 : vector<8x16x1xi32> to vector<8x16x128xi32>
    %5 = arith.cmpi eq, %4, %2 : vector<8x16x128xi32>
    %6 = arith.extui %5 : vector<8x16x128xi1> to vector<8x16x128xi32>
    %7 = arith.sitofp %6 : vector<8x16x128xi32> to vector<8x16x128xf32>
    %8 = arith.truncf %7 : vector<8x16x128xf32> to vector<8x16x128xbf16>
    %9 = vector.extract_strided_slice %1 {offsets = [0, 1, 0], sizes = [8, 16, 1], strides = [1, 1, 1]} : vector<8x20x1xi32> to vector<8x16x1xi32>
    %10 = vector.broadcast %9 : vector<8x16x1xi32> to vector<8x16x128xi32>
    %11 = arith.cmpi eq, %10, %2 : vector<8x16x128xi32>
    %12 = arith.extui %11 : vector<8x16x128xi1> to vector<8x16x128xi32>
    %13 = arith.sitofp %12 : vector<8x16x128xi32> to vector<8x16x128xf32>
    %14 = arith.truncf %13 : vector<8x16x128xf32> to vector<8x16x128xbf16>
    %15 = vector.extract_strided_slice %1 {offsets = [0, 2, 0], sizes = [8, 16, 1], strides = [1, 1, 1]} : vector<8x20x1xi32> to vector<8x16x1xi32>
    %16 = vector.broadcast %15 : vector<8x16x1xi32> to vector<8x16x128xi32>
    %17 = arith.cmpi eq, %16, %2 : vector<8x16x128xi32>
    %18 = arith.extui %17 : vector<8x16x128xi1> to vector<8x16x128xi32>
    %19 = arith.sitofp %18 : vector<8x16x128xi32> to vector<8x16x128xf32>
    %20 = arith.truncf %19 : vector<8x16x128xf32> to vector<8x16x128xbf16>
    %21 = vector.extract_strided_slice %1 {offsets = [0, 3, 0], sizes = [8, 16, 1], strides = [1, 1, 1]} : vector<8x20x1xi32> to vector<8x16x1xi32>
    %22 = vector.broadcast %21 : vector<8x16x1xi32> to vector<8x16x128xi32>
    %23 = arith.cmpi eq, %22, %2 : vector<8x16x128xi32>
    %24 = arith.extui %23 : vector<8x16x128xi1> to vector<8x16x128xi32>
    %25 = arith.sitofp %24 : vector<8x16x128xi32> to vector<8x16x128xf32>
    %26 = arith.truncf %25 : vector<8x16x128xf32> to vector<8x16x128xbf16>
    %27 = vector.extract_strided_slice %1 {offsets = [0, 4, 0], sizes = [8, 16, 1], strides = [1, 1, 1]} : vector<8x20x1xi32> to vector<8x16x1xi32>
    %28 = vector.broadcast %27 : vector<8x16x1xi32> to vector<8x16x128xi32>
    %29 = arith.cmpi eq, %28, %2 : vector<8x16x128xi32>
    %30 = arith.extui %29 : vector<8x16x128xi1> to vector<8x16x128xi32>
    %31 = arith.sitofp %30 : vector<8x16x128xi32> to vector<8x16x128xf32>
    %32 = arith.truncf %31 : vector<8x16x128xf32> to vector<8x16x128xbf16>
    %33 = tpu.concatenate %8, %14, %20, %26, %32 in 2 : vector<8x16x128xbf16>, vector<8x16x128xbf16>, vector<8x16x128xbf16>, vector<8x16x128xbf16>, vector<8x16x128xbf16> -> vector<8x16x640xbf16>
    %34 = vector.shape_cast %33 : vector<8x16x640xbf16> to vector<128x640xbf16>
    %c0_1 = arith.constant 0 : index
    %c0_2 = arith.constant 0 : index
    %35 = vector.load %arg2[%c0_1, %c0_2] : memref<640x32xbf16, #tpu.memory_space<vmem>>, vector<640x32xbf16>
    %cst = arith.constant dense<0.000000e+00> : vector<128x32xf32>
    %36 = tpu.matmul %34, %35, %cst {dimension_numbers = #tpu.dot_dimension_numbers<[1], [0], [0], [1], [0, 0, 1, 1], [], []>} : vector<128x640xbf16>, vector<640x32xbf16>, vector<128x32xf32> -> vector<128x32xf32>
    %37 = vector.shape_cast %36 : vector<128x32xf32> to vector<8x16x32xf32>
    %cst_3 = arith.constant dense<0xFF800000> : vector<8x32xf32>
    %38 = vector.multi_reduction <maximumf>, %37, %cst_3 [1] : vector<8x16x32xf32> to vector<8x32xf32>
    %c0_4 = arith.constant 0 : index
    %c0_5 = arith.constant 0 : index
    %39 = vector.load %arg3[%c0_4, %c0_5] : memref<1x32xf32, #tpu.memory_space<vmem>>, vector<1x32xf32>
    %40 = vector.broadcast %39 : vector<1x32xf32> to vector<8x32xf32>
    %41 = arith.addf %38, %40 : vector<8x32xf32>
    %cst_6 = arith.constant 0.000000e+00 : f32
    %42 = vector.broadcast %cst_6 : f32 to vector<8x32xf32>
    %43 = arith.maximumf %41, %42 : vector<8x32xf32>
    %44 = arith.truncf %43 : vector<8x32xf32> to vector<8x32xbf16>
    %c0_7 = arith.constant 0 : index
    %c0_8 = arith.constant 0 : index
    %45 = vector.load %arg4[%c0_7, %c0_8] : memref<32x64xbf16, #tpu.memory_space<vmem>>, vector<32x64xbf16>
    %cst_9 = arith.constant dense<0.000000e+00> : vector<8x64xf32>
    %46 = tpu.matmul %44, %45, %cst_9 {dimension_numbers = #tpu.dot_dimension_numbers<[1], [0], [0], [1], [0, 0, 1, 1], [], []>} : vector<8x32xbf16>, vector<32x64xbf16>, vector<8x64xf32> -> vector<8x64xf32>
    %c0_10 = arith.constant 0 : index
    %c0_11 = arith.constant 0 : index
    %47 = vector.load %arg5[%c0_10, %c0_11] : memref<1x64xf32, #tpu.memory_space<vmem>>, vector<1x64xf32>
    %48 = vector.broadcast %47 : vector<1x64xf32> to vector<8x64xf32>
    %49 = arith.addf %46, %48 : vector<8x64xf32>
    %50 = vector.extract_strided_slice %49 {offsets = [0, 0], sizes = [8, 32], strides = [1, 1]} : vector<8x64xf32> to vector<8x32xf32>
    %cst_12 = arith.constant 0.000000e+00 : f32
    %51 = vector.broadcast %cst_12 : f32 to vector<8x32xf32>
    %52 = arith.maximumf %50, %51 : vector<8x32xf32>
    %53 = vector.extract_strided_slice %49 {offsets = [0, 32], sizes = [8, 32], strides = [1, 1]} : vector<8x64xf32> to vector<8x32xf32>
    %54 = arith.negf %53 : vector<8x32xf32>
    %55 = math.exp %54 : vector<8x32xf32>
    %cst_13 = arith.constant 1.000000e+00 : f32
    %56 = vector.broadcast %cst_13 : f32 to vector<8x32xf32>
    %57 = arith.addf %56, %55 : vector<8x32xf32>
    %58 = arith.divf %56, %57 : vector<8x32xf32>
    %59 = arith.mulf %58, %52 : vector<8x32xf32>
    %cst_14 = arith.constant 1.000000e+00 : f32
    %60 = vector.broadcast %cst_14 : f32 to vector<8x32xf32>
    %61 = arith.subf %60, %58 : vector<8x32xf32>
    %62 = arith.mulf %61, %43 : vector<8x32xf32>
    %63 = arith.addf %59, %62 : vector<8x32xf32>
    %c0_15 = arith.constant 0 : index
    %c0_16 = arith.constant 0 : index
    %64 = vector.load %arg6[%c0_15, %c0_16] : memref<8x32xf32, #tpu.memory_space<vmem>>, vector<8x32xf32>
    tpu.vector_store %arg6[%c0_15, %c0_16], %63 {strides = array<i32>} : memref<8x32xf32, #tpu.memory_space<vmem>>, vector<8x32xf32>,
    return
  }
  func.func @transform_0(%arg0: i32) -> (i32, i32) {
    %c0_i32 = arith.constant 0 : i32
    %c0_i32_0 = arith.constant 0 : i32
    return %arg0, %c0_i32 : i32, i32
  }
  func.func @transform_1(%arg0: i32) -> (i32, i32) {
    %c0_i32 = arith.constant 0 : i32
    %c0_i32_0 = arith.constant 0 : i32
    %c0_i32_1 = arith.constant 0 : i32
    return %c0_i32, %c0_i32_0 : i32, i32
  }
  func.func @transform_2(%arg0: i32) -> (i32, i32) {
    %c0_i32 = arith.constant 0 : i32
    %c0_i32_0 = arith.constant 0 : i32
    %c0_i32_1 = arith.constant 0 : i32
    return %c0_i32, %c0_i32_0 : i32, i32
  }
  func.func @transform_3(%arg0: i32) -> (i32, i32) {
    %c0_i32 = arith.constant 0 : i32
    %c0_i32_0 = arith.constant 0 : i32
    %c0_i32_1 = arith.constant 0 : i32
    return %c0_i32, %c0_i32_0 : i32, i32
  }
  func.func @transform_4(%arg0: i32) -> (i32, i32) {
    %c0_i32 = arith.constant 0 : i32
    %c0_i32_0 = arith.constant 0 : i32
    %c0_i32_1 = arith.constant 0 : i32
    return %c0_i32, %c0_i32_0 : i32, i32
  }
  func.func @transform_5(%arg0: i32) -> (i32, i32) {
    %c0_i32 = arith.constant 0 : i32
    %c0_i32_0 = arith.constant 0 : i32
    return %arg0, %c0_i32 : i32, i32
  }
}

</mosaic_0001>

<bundles_post_ra>
// kernel: tpu_custom_call.1
= control target key start
LH: loop header
LB: loop body
LE: loop exit
PB: predicated region body
PF: predicated region fallthrough
CT: control target
= control target key end

     0   :  { %v23_v0 = vlaneseq  ;;  %s2356_s0 = inlined_call_operand.vmem [shape: s32[8,20], index: 0, kind: input, shape index: {}]   ;;  %s2357_s1 = inlined_call_operand.vmem [shape: bf16[640,32], index: 1, kind: input, shape index: {}]   ;;  %s2358_s2 = inlined_call_operand.vmem [shape: f32[1,32], index: 2, kind: input, shape index: {}]   ;;  %s2359_s3 = inlined_call_operand.vmem [shape: bf16[32,64], index: 3, kind: input, shape index: {}]   ;;  %s2360_s4 = inlined_call_operand.vmem [shape: f32[1,64], index: 4, kind: input, shape index: {}]   ;;  %s2361_s5 = inlined_call_operand.hbm [shape: f32[8,32], index: 5, kind: output, shape index: {}]  }
   0x1   :  { %v1783_v1 = vld [vmem:[%s2356_s0] sm:$0xff]  ;;  %v1678_v9 = vld [vmem:[%s2357_s1 + $0x48] sm:$0xff]   ;;  %v1682_v15 = vld [vmem:[%s2357_s1 + $0x50] sm:$0xff]  }
   0x2   :  { %v1674_v2 = vld [vmem:[%s2357_s1 + $0x40] sm:$0xff]   ;;  %v1789_v3 = vshrl.u32 %v23_v0, 7  ;;  %v1679_v11 = vld [vmem:[%s2357_s1 + $0x8] sm:$0xff]   ;;  %v1683_v17 = vld [vmem:[%s2357_s1 + $0x10] sm:$0xff]  }
   0x3   :  { %v1675_v4 = vld [vmem:[%s2357_s1] sm:$0xff]   ;;  %1465 = vmatprep.subr.bf16.mxu0 %v1674_v2  ;;  %v1680_v13 = vld [vmem:[%s2357_s1 + $0xc8] sm:$0xff]   ;;  %v1684_v18 = vld [vmem:[%s2357_s1 + $0xd0] sm:$0xff]  }
   0x4   :  { %v1676_v5 = vld [vmem:[%s2357_s1 + $0xc0] sm:$0xff]   ;;  %v25_v6 = vsub.s32 0, %v1789_v3  ;;  %v40_v7 = vsub.s32 1, %v1789_v3  ;;  %1466 = vmatpush3.bf16.msra.mxu0 %v1675_v4  ;;  %v1681_v14 = vld [vmem:[%s2357_s1 + $0x88] sm:$0xff]   ;;  %v55_v16 = vsub.s32 2, %v1789_v3  ;;  %v1685_v19 = vld [vmem:[%s2357_s1 + $0x90] sm:$0xff]  }
   0x5   :  { %1529 = vmatprep.subr.bf16.mxu1 %v1676_v5  ;;  %v1677_v8 = vld [vmem:[%s2357_s1 + $0x80] sm:$0xff]   ;;  %1467 = vmatprep.subr.bf16.mxu0 %v1678_v9  ;;  %v1686_v20 = vld [vmem:[%s2357_s1 + $0x58] sm:$0xff]   ;;  %v70_v21 = vsub.s32 3, %v1789_v3  ;;  %v1694_v31 = vld [vmem:[%s2357_s1 + $0x68] sm:$0xff]   ;;  %v85_v32 = vsub.s32 4, %v1789_v3  ;;  %v100_v37 = vsub.s32 5, %v1789_v3 }
   0x6   :  { %v26_v10 = vrot.slane %v1783_v1, %v25_v6  ;;  %1530 = vmatpush3.bf16.msra.mxu1 %v1677_v8  ;;  %v41_v12 = vrot.slane %v1783_v1, %v40_v7  ;;  %v1687_v22 = vld [vmem:[%s2357_s1 + $0x18] sm:$0xff]   ;;  %v56_v23 = vrot.slane %v1783_v1, %v55_v16  ;;  %v1690_v26 = vld [vmem:[%s2357_s1 + $0x60] sm:$0xff]   ;;  %v1695_v33 = vld [vmem:[%s2357_s1 + $0x28] sm:$0xff]   ;;  %v115_v48 = vsub.s32 6, %v1789_v3 }
   0x7   :  { %1531 = vmatprep.subr.bf16.mxu1 %v1680_v13  ;;  %v1688_v24 = vld [vmem:[%s2357_s1 + $0xd8] sm:$0xff]   ;;  %v1691_v27 = vld [vmem:[%s2357_s1 + $0x20] sm:$0xff]   ;;  %v71_v28 = vrot.slane %v1783_v1, %v70_v21  ;;  %v1696_v34 = vld [vmem:[%s2357_s1 + $0xe8] sm:$0xff]   ;;  %v86_v39 = vrot.slane %v1783_v1, %v85_v32  ;;  %v101_v44 = vrot.slane %v1783_v1, %v100_v37  ;;  %v130_v49 = vsub.s32 7, %v1789_v3 }
   0x8   :  { %28 = vbcast.lane.b32.xlu0 %v26_v10, 256  ;;  %36 = vbcast.lane.b32.xlu1 %v26_v10, 272  ;;  %v1689_v25 = vld [vmem:[%s2357_s1 + $0x98] sm:$0xff]   ;;  %v1692_v29 = vld [vmem:[%s2357_s1 + $0xe0] sm:$0xff]   ;;  %v1697_v35 = vld [vmem:[%s2357_s1 + $0xa8] sm:$0xff]   ;;  %v116_v50 = vrot.slane %v1783_v1, %v115_v48 }
   0x9   :  { %1468 = vmatpush3.bf16.msra.mxu0 %v1679_v11  ;;  %v1693_v30 = vld [vmem:[%s2357_s1 + $0xa0] sm:$0xff]   ;;  %v1698_v36 = vld [vmem:[%s2357_s1 + $0x70] sm:$0xff]   ;;  %v1702_v42 = vld [vmem:[%s2357_s1 + $0x78] sm:$0xff]  }
   0xa   :  { %1532 = vmatpush3.bf16.msra.mxu1 %v1681_v14  ;;  %1469 = vmatprep.subr.bf16.mxu0 %v1682_v15  ;;  %v1699_v38 = vld [vmem:[%s2357_s1 + $0x30] sm:$0xff]   ;;  %v1703_v43 = vld [vmem:[%s2357_s1 + $0x38] sm:$0xff]   ;;  %v1899_v47 = vld [vmem:[%s2357_s1 + $0x100] sm:$0xff]  }
   0xb   :  { %1533 = vmatprep.subr.bf16.mxu1 %v1684_v18  ;;  %v1700_v40 = vld [vmem:[%s2357_s1 + $0xf0] sm:$0xff]   ;;  %v1704_v45 = vld [vmem:[%s2357_s1 + $0xf8] sm:$0xff]  }
   0xc   :  { %32 = vbcast.lane.b32.xlu0 %v26_v10, 264  ;;  %43 = vbcast.lane.b32.xlu1 %v41_v12, 256  ;;  %v1701_v41 = vld [vmem:[%s2357_s1 + $0xb0] sm:$0xff]   ;;  %v1705_v46 = vld [vmem:[%s2357_s1 + $0xb8] sm:$0xff]  }
   0xd   :  { %1470 = vmatpush3.bf16.msra.mxu0 %v1683_v17 }
   0xe   :  { %1534 = vmatpush3.bf16.msra.mxu1 %v1685_v19  ;;  %1471 = vmatprep.subr.bf16.mxu0 %v1686_v20 }
   0xf   :  { %1535 = vmatprep.subr.bf16.mxu1 %v1688_v24 }
  0x10   :  { %47 = vbcast.lane.b32.xlu0 %v41_v12, 264  ;;  %51 = vbcast.lane.b32.xlu1 %v41_v12, 272 }
  0x11   :  { %1472 = vmatpush3.bf16.msra.mxu0 %v1687_v22 }
  0x12   :  { %1536 = vmatpush3.bf16.msra.mxu1 %v1689_v25  ;;  %1473 = vmatprep.subr.bf16.mxu0 %v1690_v26 }
  0x13   :  { %1537 = vmatprep.subr.bf16.mxu1 %v1692_v29 }
  0x14   :  { %58 = vbcast.lane.b32.xlu0 %v56_v23, 256  ;;  %62 = vbcast.lane.b32.xlu1 %v56_v23, 264 }
  0x15   :  { %1474 = vmatpush3.bf16.msra.mxu0 %v1691_v27 }
  0x16   :  { %1538 = vmatpush3.bf16.msra.mxu1 %v1693_v30  ;;  %1475 = vmatprep.subr.bf16.mxu0 %v1694_v31 }
  0x17   :  { %1539 = vmatprep.subr.bf16.mxu1 %v1696_v34 }
  0x18   :  { %66 = vbcast.lane.b32.xlu0 %v56_v23, 272  ;;  %73 = vbcast.lane.b32.xlu1 %v71_v28, 256 }
  0x19   :  { %1476 = vmatpush3.bf16.msra.mxu0 %v1695_v33 }
  0x1a   :  { %1540 = vmatpush3.bf16.msra.mxu1 %v1697_v35  ;;  %1477 = vmatprep.subr.bf16.mxu0 %v1698_v36 }
  0x1b   :  { %1541 = vmatprep.subr.bf16.mxu1 %v1700_v40 }
  0x1c   :  { %77 = vbcast.lane.b32.xlu0 %v71_v28, 264  ;;  %81 = vbcast.lane.b32.xlu1 %v71_v28, 272 }
  0x1d   :  { %1478 = vmatpush3.bf16.msra.mxu0 %v1699_v38 }
  0x1e   :  { %1542 = vmatpush3.bf16.msra.mxu1 %v1701_v41  ;;  %1479 = vmatprep.subr.bf16.mxu0 %v1702_v42 }
  0x1f   :  { %1543 = vmatprep.subr.bf16.mxu1 %v1704_v45 }
  0x20   :  { %88 = vbcast.lane.b32.xlu0 %v86_v39, 256  ;;  %92 = vbcast.lane.b32.xlu1 %v86_v39, 264 }
  0x21   :  { %1480 = vmatpush3.bf16.msra.mxu0 %v1703_v43 }
  0x22   :  { %1544 = vmatpush3.bf16.msra.mxu1 %v1705_v46  ;;  %1612 = vmatprep.subr.bf16.mxu0 %v1899_v47 }
  0x23   :  { %1652 = vmatprep.subr.bf16.mxu1 %v1899_v47 }
  0x24   :  { %96 = vbcast.lane.b32.xlu0 %v86_v39, 272  ;;  %103 = vbcast.lane.b32.xlu1 %v101_v44, 256 }
  0x28   :  { %107 = vbcast.lane.b32.xlu0 %v101_v44, 264  ;;  %111 = vbcast.lane.b32.xlu1 %v101_v44, 272 }
  0x29   :  { %10 = vsyncpa [#allocation3], 0  ;;  %v131_v51 = vrot.slane %v1783_v1, %v130_v49  ;;  %v1908_v52 = vand.u32 127, %v23_v0  ;;  %v1744_v55 = vmov 0.0   ;;  %vm233_vm4 = vsmask.f32 7424 }
  0x2a   :  { %vm354_vm5 = vcmask 1046528   ;;  %vm387_vm8 = vsmask.f32 6400  ;;  %v1707_v31 = vld [vmem:[%s2357_s1 + $0x108] sm:$0xff]   ;;  %v1745_v38 = vmov 1.0|1.0  }
  0x2b   :  { %v1708_v49 = vld [vmem:[%s2357_s1 + $0x110] sm:$0xff]   ;;  %s1749_s27 = smov [#allocation2]  }
  0x2c   :  { %118 = vbcast.lane.b32.xlu0 %v116_v50, 256  ;;  %122 = vbcast.lane.b32.xlu1 %v116_v50, 264  ;;  %s1371_s28 = sshll.u32 %s1749_s27, 4  ;;  %s1372_s28 = int_to_ptr.vmem [resolvable:$true] %s1371_s28 }
  0x2d   :  { %s1720_s29 = scalar_lea.vmem %s1372_s28, 128  ;;  %p1725_p1 = scmp.lt.s32.totalorder %s1372_s28, %s1372_s28 }
  0x2e   :  { %p1721_p0 = scmp.ne.s32.totalorder %s1372_s28, %s1720_s29  ;;  %p1726_p2 = scmp.lt.s32.totalorder %s1720_s29, %s1720_s29 }
  0x30   :  { %126 = vbcast.lane.b32.xlu0 %v116_v50, 272  ;;  %133 = vbcast.lane.b32.xlu1 %v131_v51, 256  ;;  %p1727_p3 = por %p1726_p2, %p1725_p1 }
  0x32   :  { %p1728_p4 = pnand %p1727_p3, %p1721_p0 }
  0x34   :  { %137 = vbcast.lane.b32.xlu0 %v131_v51, 264  ;;  %141 = vbcast.lane.b32.xlu1 %v131_v51, 272 }
  0x7a   :  { %v29_v53 = vpop.permute.xlu0 %28  ;;  %v37_v54 = vpop.permute.xlu1 %36 }
  0x7b   :  { %vm201_vm0 = vcmp.eq.s32.totalorder %v37_v54, %v1908_v52  ;;  %vm145_vm1 = vcmp.eq.s32.totalorder %v29_v53, %v1908_v52 }
  0x7c   :  { %v1395_v56 = vsel %vm201_vm0, 1.0, %v1744_v55  ;;  %v1379_v62 = vsel %vm145_vm1, 1.0, %v1744_v55 }
  0x7d   :  { %v1913_v57 = vpack.c.bf16 %v1395_v56, %v1395_v56 }
  0x7e   :  { %v33_v58 = vpop.permute.xlu0 %32  ;;  %v1915_v59 = vpop.permute.xlu1 %43 }
  0x7f   :  { %vm146_vm2 = vcmp.eq.s32.totalorder %v33_v58, %v1908_v52  ;;  %vm147_vm3 = vcmp.eq.s32.totalorder %v1915_v59, %v1908_v52  ;;  %v242_v60 = vshll.u32 %v1913_v57, 16  ;;  %v391_v61 = vshrl.u32 %v1913_v57, 16 }
  0x80   :  { %v1380_v63 = vsel %vm146_vm2, 1.0, %v1744_v55  ;;  %v1381_v1 = vsel %vm147_vm3, 1.0, %v1744_v55  ;;  %v356_v6 = vrot.slane %v1913_v57, 1  ;;  %vm1443_vm11 = vmpackc.low %vm146_vm2, %vm145_vm1 }
  0x81   :  { %v1928_v0 = vpack.c.bf16 %v1380_v63, %v1379_v62  ;;  %v393_v4 = vrot.slane %v391_v61, 1  ;;  %v394_v5 = vrot.slane %v242_v60, 2  ;;  %v244_v11 = vrot.slane %v242_v60, 1 }
  0x82   :  { %v1934_v2 = vpop.permute.xlu0 %47  ;;  %v52_v3 = vpop.permute.xlu1 %51 }
  0x83   :  { %vm148_vm6 = vcmp.eq.s32.totalorder %v1934_v2, %v1908_v52  ;;  %vm202_vm7 = vcmp.eq.s32.totalorder %v52_v3, %v1908_v52  ;;  %v235_v7 = vshrl.u32 %v1928_v0, 16  ;;  %v237_v8 = vshll.u32 %v1928_v0, 16 }
  0x84   :  { %v1382_v9 = vsel %vm148_vm6, 1.0, %v1744_v55  ;;  %v1396_v10 = vsel %vm202_vm7, 1.0, %v1744_v55  ;;  %v355_v12 = vrot.slane %v1928_v0, 1  ;;  %v395_v20 = vor.u32 %v394_v5, %v393_v4  ;;  %vm1445_vm0 = vmpackc.low %vm148_vm6, %vm147_vm3 }
  0x85   :  { %v1948_v13 = vpack.c.bf16 %v1382_v9, %v1381_v1  ;;  %v1950_v14 = vpack.c.bf16 %v1396_v10, %v1396_v10  ;;  %v239_v15 = vrot.slane %v237_v8, 1  ;;  %v388_v16 = vrot.slane %v235_v7, 1 }
  0x86   :  { %v1952_v17 = vpop.permute.xlu0 %58  ;;  %v1954_v18 = vpop.permute.xlu1 %62  ;;  %v389_v19 = vrot.slane %v237_v8, 2  ;;  %v357_v22 = vsel %vm354_vm5, %v355_v12, %v356_v6 }
  0x87   :  { %vm149_vm9 = vcmp.eq.s32.totalorder %v1952_v17, %v1908_v52  ;;  %vm150_vm10 = vcmp.eq.s32.totalorder %v1954_v18, %v1908_v52  ;;  %v240_v21 = vor.u32 %v239_v15, %v235_v7  ;;  %v247_v26 = vshrl.u32 %v1948_v13, 16  ;;  %v1709_v7 = vld [vmem:[%s2357_s1 + $0x118] sm:$0xff]  }
  0x88   :  { %v1383_v23 = vsel %vm149_vm9, 1.0, %v1744_v55  ;;  %v1384_v24 = vsel %vm150_vm10, 1.0, %v1744_v55  ;;  %v390_v25 = vor.u32 %v389_v19, %v388_v16  ;;  %v249_v29 = vshll.u32 %v1948_v13, 16  ;;  %vm1447_vm7 = vmpackc.low %vm150_vm10, %vm149_vm9 }
  0x89   :  { %v1970_v27 = vpack.c.bf16 %v1384_v24, %v1383_v23  ;;  %v245_v28 = vsel %vm233_vm4, %v240_v21, %v244_v11  ;;  %v254_v30 = vshll.u32 %v1950_v14, 16  ;;  %v397_v35 = vrot.slane %v247_v26, 1 }
  0x8a   :  { %853 = vmatprep.mubr.bf16.mxu0 %v245_v28  ;;  %v396_v32 = vsel %vm387_vm8, %v390_v25, %v395_v20  ;;  %v67_v33 = vpop.permute.xlu0 %66  ;;  %v1983_v34 = vpop.permute.xlu1 %73  ;;  %v400_v36 = vshrl.u32 %v1950_v14, 16  ;;  %v358_v37 = vrot.slane %v1948_v13, 1  ;;  %v251_v39 = vrot.slane %v249_v29, 1 }
  0x8b   :  { %950 = vmatprep.mubr.bf16.mxu1 %v396_v32  ;;  %1444 = vmatmul.mubr.msk.bf16.vlgmr.msra.gmra.mrb[0].mxu0 %vm1443_vm11, %v1745_v38  ;;  %vm203_vm12 = vcmp.eq.s32.totalorder %v67_v33, %v1908_v52  ;;  %v256_v40 = vrot.slane %v254_v30, 1  ;;  %vm151_vm13 = vcmp.eq.s32.totalorder %v1983_v34, %v1908_v52  ;;  %v398_v42 = vrot.slane %v249_v29, 2  ;;  %v1713_v34 = vld [vmem:[%s2357_s1 + $0x138] sm:$0xff]  }
  0x8c   :  { %951 = vmatmul.mubr.bf16.vlgmr.msra.gmra.mrb[0].mxu1 %v357_v22  ;;  %1613 = vmatpush3.bf16.msra.mxu0 %v1899_v47  ;;  %v1397_v41 = vsel %vm203_vm12, 1.0, %v1744_v55  ;;  %v402_v43 = vrot.slane %v400_v36, 1  ;;  %v252_v45 = vor.u32 %v251_v39, %v247_v26  ;;  %v403_v46 = vrot.slane %v254_v30, 2  ;;  %v1710_v26 = vld [vmem:[%s2357_s1 + $0x120] sm:$0xff]  }
  0x8d   :  { %v1993_v44 = vpack.c.bf16 %v1397_v41, %v1397_v41  ;;  %1614 = vmatprep.subr.bf16.mxu0 %v1707_v31  ;;  %v359_v48 = vrot.slane %v1950_v14, 1  ;;  %1660 = vmatpush3.bf16.msra.mxu1 %v1899_v47  ;;  %v1385_v50 = vsel %vm151_vm13, 1.0, %v1744_v55  ;;  %v399_v51 = vor.u32 %v398_v42, %v397_v35 }
  0x8e   :  { %v2004_v53 = vpop.permute.xlu0 %77  ;;  %v82_v54 = vpop.permute.xlu1 %81  ;;  %v259_v56 = vshrl.u32 %v1970_v27, 16  ;;  %v261_v58 = vshll.u32 %v1970_v27, 16  ;;  %1653 = vmatprep.subr.bf16.mxu1 %v1707_v31  ;;  %v257_v60 = vsel %vm233_vm4, %v252_v45, %v256_v40  ;;  %v404_v61 = vor.u32 %v403_v46, %v402_v43 }
  0x8f   :  { %vm152_vm14 = vcmp.eq.s32.totalorder %v2004_v53, %v1908_v52  ;;  %v360_v47 = vsel %vm354_vm5, %v358_v37, %v359_v48  ;;  %861 = vmatprep.mubr.bf16.mxu0 %v257_v60  ;;  %vm204_vm15 = vcmp.eq.s32.totalorder %v82_v54, %v1908_v52  ;;  %v266_v1 = vshll.u32 %v1993_v44, 16  ;;  %v1711_v48 = vld [vmem:[%s2357_s1 + $0x128] sm:$0xff]  }
  0x90   :  { %v1386_v62 = vsel %vm152_vm14, 1.0, %v1744_v55  ;;  %1615 = vmatpush3.bf16.msra.mxu0 %v1707_v31  ;;  %v263_v63 = vrot.slane %v261_v58, 1  ;;  %v405_v3 = vsel %vm387_vm8, %v399_v51, %v404_v61  ;;  %v1398_v5 = vsel %vm204_vm15, 1.0, %v1744_v55  ;;  %vm1449_vm15 = vmpackc.low %vm152_vm14, %vm151_vm13 }
  0x91   :  { %v2019_v4 = vpack.c.bf16 %v1386_v62, %v1385_v50  ;;  %v406_v6 = vrot.slane %v259_v56, 1  ;;  %1616 = vmatprep.subr.bf16.mxu0 %v1708_v49  ;;  %1661 = vmatpush3.bf16.msra.mxu1 %v1707_v31  ;;  %v2031_v8 = vpack.c.bf16 %v1398_v5, %v1398_v5  ;;  %v268_v10 = vrot.slane %v266_v1, 1 }
  0x92   :  { %958 = vmatprep.mubr.bf16.mxu1 %v405_v3  ;;  %v264_v9 = vor.u32 %v263_v63, %v259_v56  ;;  %v407_v11 = vrot.slane %v261_v58, 2  ;;  %v2033_v12 = vpop.permute.xlu0 %88  ;;  %v2035_v15 = vpop.permute.xlu1 %92  ;;  %1654 = vmatprep.subr.bf16.mxu1 %v1708_v49  ;;  %v409_v16 = vshrl.u32 %v1993_v44, 16  ;;  %v412_v59 = vrot.slane %v266_v1, 2 }
  0x93   :  { %1446 = vmatmul.mubr.msk.bf16.gmra.mrb[4].mxu0 %vm1445_vm0, %v1745_v38  ;;  %vm153_vm1 = vcmp.eq.s32.totalorder %v2033_v12, %v1908_v52  ;;  %vm154_vm2 = vcmp.eq.s32.totalorder %v2035_v15, %v1908_v52  ;;  %v361_v21 = vrot.slane %v1970_v27, 1  ;;  %v362_v24 = vrot.slane %v1993_v44, 1 }
  0x94   :  { %959 = vmatmul.mubr.bf16.gmra.mrb[4].mxu1 %v360_v47  ;;  %v269_v2 = vsel %vm233_vm4, %v264_v9, %v268_v10  ;;  %v1387_v19 = vsel %vm153_vm1, 1.0, %v1744_v55  ;;  %v1388_v20 = vsel %vm154_vm2, 1.0, %v1744_v55  ;;  %1617 = vmatpush3.bf16.msra.mxu0 %v1708_v49  ;;  %v408_v22 = vor.u32 %v407_v11, %v406_v6  ;;  %v1712_v6 = vld [vmem:[%s2357_s1 + $0x130] sm:$0xff]  }
  0x95   :  { %869 = vmatprep.mubr.bf16.mxu0 %v269_v2  ;;  %v411_v23 = vrot.slane %v409_v16, 1  ;;  %v271_v25 = vshrl.u32 %v2019_v4, 16  ;;  %1618 = vmatprep.subr.bf16.mxu0 %v1709_v7  ;;  %v2058_v28 = vpack.c.bf16 %v1388_v20, %v1387_v19  ;;  %v273_v30 = vshll.u32 %v2019_v4, 16 }
  0x96   :  { %v97_v29 = vpop.permute.xlu0 %96  ;;  %v278_v31 = vshll.u32 %v2031_v8, 16  ;;  %v2062_v32 = vpop.permute.xlu1 %103  ;;  %v418_v33 = vshrl.u32 %v2031_v8, 16  ;;  %1662 = vmatpush3.bf16.msra.mxu1 %v1708_v49  ;;  %v364_v36 = vrot.slane %v2019_v4, 1  ;;  %v363_v37 = vsel %vm354_vm5, %v361_v21, %v362_v24 }
  0x97   :  { %v413_v35 = vor.u32 %v412_v59, %v411_v23  ;;  %vm205_vm3 = vcmp.eq.s32.totalorder %v97_v29, %v1908_v52  ;;  %vm155_vm6 = vcmp.eq.s32.totalorder %v2062_v32, %v1908_v52  ;;  %1655 = vmatprep.subr.bf16.mxu1 %v1709_v7  ;;  %v275_v40 = vrot.slane %v273_v30, 1 }
  0x98   :  { %v1399_v39 = vsel %vm205_vm3, 1.0, %v1744_v55  ;;  %v280_v41 = vrot.slane %v278_v31, 1  ;;  %1619 = vmatpush3.bf16.msra.mxu0 %v1709_v7  ;;  %v415_v45 = vrot.slane %v271_v25, 1  ;;  %v416_v46 = vrot.slane %v273_v30, 2 }
  0x99   :  { %v414_v42 = vsel %vm387_vm8, %v408_v22, %v413_v35  ;;  %v2072_v43 = vpack.c.bf16 %v1399_v39, %v1399_v39  ;;  %1620 = vmatprep.subr.bf16.mxu0 %v1710_v26  ;;  %v276_v49 = vor.u32 %v275_v40, %v271_v25  ;;  %v1389_v50 = vsel %vm155_vm6, 1.0, %v1744_v55 }
  0x9a   :  { %966 = vmatprep.mubr.bf16.mxu1 %v414_v42  ;;  %v420_v51 = vrot.slane %v418_v33, 1  ;;  %v421_v54 = vrot.slane %v278_v31, 2  ;;  %v2087_v56 = vpop.permute.xlu0 %107  ;;  %v112_v58 = vpop.permute.xlu1 %111  ;;  %1663 = vmatpush3.bf16.msra.mxu1 %v1709_v7  ;;  %v417_v17 = vor.u32 %v416_v46, %v415_v45  ;;  %v283_v18 = vshrl.u32 %v2058_v28, 16 }
  0x9b   :  { %1448 = vmatmul.mubr.msk.bf16.gmra.mrb[8].mxu0 %vm1447_vm7, %v1745_v38  ;;  %vm156_vm11 = vcmp.eq.s32.totalorder %v2087_v56, %v1908_v52  ;;  %vm206_vm9 = vcmp.eq.s32.totalorder %v112_v58, %v1908_v52  ;;  %1656 = vmatprep.subr.bf16.mxu1 %v1710_v26  ;;  %v281_v60 = vsel %vm233_vm4, %v276_v49, %v280_v41  ;;  %v365_v62 = vrot.slane %v2031_v8, 1  ;;  %vm1451_vm7 = vmpackc.low %vm154_vm2, %vm153_vm1 }
  0x9c   :  { %967 = vmatmul.mubr.bf16.gmra.mrb[8].mxu1 %v363_v37  ;;  %v422_v61 = vor.u32 %v421_v54, %v420_v51  ;;  %v1390_v47 = vsel %vm156_vm11, 1.0, %v1744_v55  ;;  %1621 = vmatpush3.bf16.msra.mxu0 %v1710_v26  ;;  %v1400_v1 = vsel %vm206_vm9, 1.0, %v1744_v55  ;;  %v285_v3 = vshll.u32 %v2058_v28, 16  ;;  %vm1453_vm1 = vmpackc.low %vm156_vm11, %vm155_vm6 }
  0x9d   :  { %877 = vmatprep.mubr.bf16.mxu0 %v281_v60  ;;  %v2100_v63 = vpack.c.bf16 %v1390_v47, %v1389_v50  ;;  %v290_v5 = vshll.u32 %v2072_v43, 16  ;;  %1622 = vmatprep.subr.bf16.mxu0 %v1711_v48  ;;  %v2109_v9 = vpack.c.bf16 %v1400_v1, %v1400_v1  ;;  %v424_v10 = vrot.slane %v283_v18, 1 }
  0x9e   :  { %v423_v7 = vsel %vm387_vm8, %v417_v17, %v422_v61  ;;  %v427_v11 = vshrl.u32 %v2072_v43, 16  ;;  %v2112_v16 = vpop.permute.xlu0 %118  ;;  %v2114_v59 = vpop.permute.xlu1 %122  ;;  %1664 = vmatpush3.bf16.msra.mxu1 %v1710_v26  ;;  %v287_v2 = vrot.slane %v285_v3, 1  ;;  %v425_v20 = vrot.slane %v285_v3, 2 }
  0x9f   :  { %974 = vmatprep.mubr.bf16.mxu1 %v423_v7  ;;  %v292_v19 = vrot.slane %v290_v5, 1  ;;  %v430_v21 = vrot.slane %v290_v5, 2  ;;  %1657 = vmatprep.subr.bf16.mxu1 %v1711_v48  ;;  %vm157_vm10 = vcmp.eq.s32.totalorder %v2112_v16, %v1908_v52  ;;  %vm158_vm12 = vcmp.eq.s32.totalorder %v2114_v59, %v1908_v52 }
  0xa0   :  { %v429_v22 = vrot.slane %v427_v11, 1  ;;  %1623 = vmatpush3.bf16.msra.mxu0 %v1711_v48  ;;  %v366_v23 = vsel %vm354_vm5, %v364_v36, %v365_v62  ;;  %v288_v24 = vor.u32 %v287_v2, %v283_v18  ;;  %v426_v25 = vor.u32 %v425_v20, %v424_v10  ;;  %vm1455_vm6 = vmpackc.low %vm158_vm12, %vm157_vm10 }
  0xa1   :  { %1624 = vmatprep.subr.bf16.mxu0 %v1712_v6  ;;  %v1391_v29 = vsel %vm157_vm10, 1.0, %v1744_v55  ;;  %v1392_v30 = vsel %vm158_vm12, 1.0, %v1744_v55  ;;  %v295_v33 = vshrl.u32 %v2100_v63, 16  ;;  %v297_v36 = vshll.u32 %v2100_v63, 16 }
  0xa2   :  { %v431_v26 = vor.u32 %v430_v21, %v429_v22  ;;  %v127_v31 = vpop.permute.xlu0 %126  ;;  %v2136_v35 = vpop.permute.xlu1 %133  ;;  %1665 = vmatpush3.bf16.msra.mxu1 %v1711_v48  ;;  %v293_v53 = vsel %vm233_vm4, %v288_v24, %v292_v19  ;;  %v302_v37 = vshll.u32 %v2109_v9, 16  ;;  %v367_v40 = vrot.slane %v2058_v28, 1 }
  0xa3   :  { %1450 = vmatmul.mubr.msk.bf16.gmra.mrb[12].mxu0 %vm1449_vm15, %v1745_v38  ;;  %vm207_vm13 = vcmp.eq.s32.totalorder %v127_v31, %v1908_v52  ;;  %1658 = vmatprep.subr.bf16.mxu1 %v1712_v6  ;;  %vm159_vm14 = vcmp.eq.s32.totalorder %v2136_v35, %v1908_v52  ;;  %v2151_v42 = vpack.c.bf16 %v1392_v30, %v1391_v29  ;;  %v368_v45 = vrot.slane %v2072_v43, 1 }
  0xa4   :  { %975 = vmatmul.mubr.bf16.gmra.mrb[12].mxu1 %v366_v23  ;;  %885 = vmatprep.mubr.bf16.mxu0 %v293_v53  ;;  %v432_v39 = vsel %vm387_vm8, %v426_v25, %v431_v26  ;;  %v1401_v41 = vsel %vm207_vm13, 1.0, %v1744_v55  ;;  %v299_v46 = vrot.slane %v297_v36, 1  ;;  %v304_v48 = vrot.slane %v302_v37, 1 }
  0xa5   :  { %982 = vmatprep.mubr.bf16.mxu1 %v432_v39  ;;  %1625 = vmatpush3.bf16.msra.mxu0 %v1712_v6  ;;  %v433_v49 = vrot.slane %v295_v33, 1  ;;  %v434_v50 = vrot.slane %v297_v36, 2  ;;  %v436_v51 = vshrl.u32 %v2109_v9, 16  ;;  %v439_v54 = vrot.slane %v302_v37, 2 }
  0xa6   :  { %v2155_v58 = vpop.permute.xlu0 %137  ;;  %v142_v17 = vpop.permute.xlu1 %141  ;;  %1626 = vmatprep.subr.bf16.mxu0 %v1713_v34  ;;  %1666 = vmatpush3.bf16.msra.mxu1 %v1712_v6  ;;  %v2157_v18 = vpack.c.bf16 %v1401_v41, %v1401_v41  ;;  %v300_v60 = vor.u32 %v299_v46, %v295_v33  ;;  %v1393_v61 = vsel %vm159_vm14, 1.0, %v1744_v55  ;;  %v307_v10 = vshrl.u32 %v2151_v42, 16 }
  0xa7   :  { %vm160_vm0 = vcmp.eq.s32.totalorder %v2155_v58, %v1908_v52  ;;  %1659 = vmatprep.subr.bf16.mxu1 %v1713_v34  ;;  %v435_v47 = vor.u32 %v434_v50, %v433_v49  ;;  %v438_v62 = vrot.slane %v436_v51, 1  ;;  %vm208_vm3 = vcmp.eq.s32.totalorder %v142_v17, %v1908_v52 }
  0xa8   :  { %v1394_v1 = vsel %vm160_vm0, 1.0, %v1744_v55  ;;  %v305_v3 = vsel %vm233_vm4, %v300_v60, %v304_v48  ;;  %v1402_v5 = vsel %vm208_vm3, 1.0, %v1744_v55  ;;  %v309_v11 = vshll.u32 %v2151_v42, 16 }
  0xa9   :  { %1627 = vmatpush3.bf16.msra.mxu0 %v1713_v34  ;;  %v440_v6 = vor.u32 %v439_v54, %v438_v62  ;;  %v2178_v7 = vpack.c.bf16 %v1394_v1, %v1393_v61  ;;  %v369_v2 = vsel %vm354_vm5, %v367_v40, %v368_v45  ;;  %v2184_v19 = vpack.c.bf16 %v1402_v5, %v1402_v5 }
  0xaa   :  { %1667 = vmatpush3.bf16.msra.mxu1 %v1713_v34  ;;  %v314_v12 = vshll.u32 %v2157_v18, 16  ;;  %v445_v20 = vshrl.u32 %v2157_v18, 16  ;;  %v370_v21 = vrot.slane %v2100_v63, 1  ;;  %v311_v22 = vrot.slane %v309_v11, 1 }
  0xab   :  { %1452 = vmatmul.mubr.msk.bf16.gmra.mrb[16].mxu0 %vm1451_vm7, %v1745_v38  ;;  %1644 = vmatprep.subr.bf16.mxu1 %v1744_v55  ;;  %v441_v15 = vsel %vm387_vm8, %v435_v47, %v440_v6  ;;  %v442_v23 = vrot.slane %v307_v10, 1  ;;  %v443_v25 = vrot.slane %v309_v11, 2  ;;  %v371_v30 = vrot.slane %v2109_v9, 1 }
  0xac   :  { %983 = vmatmul.mubr.bf16.gmra.mrb[16].mxu1 %v369_v2  ;;  %893 = vmatprep.mubr.bf16.mxu0 %v305_v3  ;;  %v316_v24 = vrot.slane %v314_v12, 1  ;;  %v447_v26 = vrot.slane %v445_v20, 1  ;;  %v448_v29 = vrot.slane %v314_v12, 2  ;;  %v312_v31 = vor.u32 %v311_v22, %v307_v10 }
  0xad   :  { %990 = vmatprep.mubr.bf16.mxu1 %v441_v15  ;;  %v319_v33 = vshrl.u32 %v2178_v7, 16  ;;  %v321_v34 = vshll.u32 %v2178_v7, 16  ;;  %v444_v53 = vor.u32 %v443_v25, %v442_v23  ;;  %v326_v37 = vshll.u32 %v2184_v19, 16 }
  0xae   :  { %v449_v36 = vor.u32 %v448_v29, %v447_v26  ;;  %v454_v39 = vshrl.u32 %v2184_v19, 16  ;;  %v473_v40 = vrot.slane %v1950_v14, 2  ;;  %v317_v41 = vsel %vm233_vm4, %v312_v31, %v316_v24 }
  0xaf   :  { %v323_v45 = vrot.slane %v321_v34, 1  ;;  %v451_v46 = vrot.slane %v319_v33, 1  ;;  %v452_v49 = vrot.slane %v321_v34, 2  ;;  %v457_v51 = vrot.slane %v326_v37, 2 }
  0xb0   :  { %v450_v48 = vsel %vm387_vm8, %v444_v53, %v449_v36  ;;  %v456_v50 = vrot.slane %v454_v39, 1  ;;  %v372_v14 = vsel %vm354_vm5, %v370_v21, %v371_v30  ;;  %v472_v54 = vrot.slane %v1948_v13, 2 }
  0xb1   :  { %v324_v17 = vor.u32 %v323_v45, %v319_v33  ;;  %v328_v32 = vrot.slane %v326_v37, 1  ;;  %vm468_vm2 = vcmask 1045504   ;;  %v453_v60 = vor.u32 %v452_v49, %v451_v46 }
  0xb2   :  { %v458_v56 = vor.u32 %v457_v51, %v456_v50  ;;  %v474_v61 = vsel %vm468_vm2, %v472_v54, %v473_v40  ;;  %v373_v47 = vrot.slane %v2151_v42, 1  ;;  %v374_v62 = vrot.slane %v2157_v18, 1 }
  0xb3   :  { %1454 = vmatmul.mubr.msk.bf16.gmra.mrb[20].mxu0 %vm1453_vm1, %v1745_v38  ;;  %v329_v1 = vsel %vm233_vm4, %v324_v17, %v328_v32  ;;  %v376_v5 = vrot.slane %v2178_v7, 1  ;;  %v377_v6 = vrot.slane %v2184_v19, 1  ;;  %v469_v10 = vrot.slane %v1928_v0, 2  ;;  %vm1457_vm4 = vmpackc.low %vm160_vm0, %vm159_vm14 }
  0xb4   :  { %991 = vmatmul.mubr.bf16.gmra.mrb[20].mxu1 %v372_v14  ;;  %901 = vmatprep.mubr.bf16.mxu0 %v317_v41  ;;  %v459_v13 = vsel %vm387_vm8, %v453_v60, %v458_v56  ;;  %v375_v3 = vsel %vm354_vm5, %v373_v47, %v374_v62  ;;  %v470_v16 = vrot.slane %v1913_v57, 2  ;;  %v487_v59 = vrot.slane %v2151_v42, 2 }
  0xb5   :  { %998 = vmatprep.mubr.bf16.mxu1 %v450_v48  ;;  %v488_v11 = vrot.slane %v2157_v18, 2  ;;  %v378_v2 = vsel %vm354_vm5, %v376_v5, %v377_v6  ;;  %v491_v0 = vrot.slane %v2184_v19, 2  ;;  %v490_v42 = vrot.slane %v2178_v7, 2 }
  0xb6   :  { %v471_v12 = vsel %vm468_vm2, %v469_v10, %v470_v16  ;;  %v475_v35 = vrot.slane %v1970_v27, 2  ;;  %v476_v52 = vrot.slane %v1993_v44, 2  ;;  %v478_v18 = vrot.slane %v2019_v4, 2  ;;  %v1714_v4 = vld [vmem:[%s2359_s3] sm:$0xff]  }
  0xb7   :  { %v489_v57 = vsel %vm468_vm2, %v487_v59, %v488_v11  ;;  %v479_v20 = vrot.slane %v2031_v8, 2  ;;  %v481_v15 = vrot.slane %v2058_v28, 2  ;;  %v482_v19 = vrot.slane %v2072_v43, 2  ;;  %v1715_v8 = vld [vmem:[%s2359_s3 + $0x8] sm:$0xff]  }
  0xb8   :  { %v477_v58 = vsel %vm468_vm2, %v475_v35, %v476_v52  ;;  %v484_v44 = vrot.slane %v2100_v63, 2  ;;  %v485_v21 = vrot.slane %v2109_v9, 2  ;;  %vm1746_vm5 = vmmov 0  }
  0xb9   :  { %v480_v7 = vsel %vm468_vm2, %v478_v18, %v479_v20  ;;  %v483_v27 = vsel %vm468_vm2, %v481_v15, %v482_v19  ;;  %vm1112_vm8 = vcmask 261120   ;;  %vm1244_vm11 = vcmask 1041409  }
  0xba   :  { %v486_v22 = vsel %vm468_vm2, %v484_v44, %v485_v21  ;;  %vm1247_vm9 = vcmask 1042434   ;;  %vm1250_vm10 = vcmask 1043459   ;;  %vm1253_vm12 = vcmask 1044484  }
  0xbb   :  { %1456 = vmatmul.mubr.msk.bf16.gmra.mrb[24].mxu0 %vm1455_vm6, %v1745_v38  ;;  %vm1256_vm15 = vcmask 1045509   ;;  %vm1259_vm13 = vcmask 1046534   ;;  %vm1262_vm14 = vcmask 1047559  }
  0xbc   :  { %999 = vmatmul.mubr.bf16.gmra.mrb[24].mxu1 %v375_v3  ;;  %909 = vmatprep.mubr.bf16.mxu0 %v329_v1 }
  0xbd   :  { %1006 = vmatprep.mubr.bf16.mxu1 %v459_v13 }
  0xc3   :  { %1458 = vmatmul.mubr.msk.bf16.gmra.mrb[28].mxu0 %vm1457_vm4, %v1745_v38  ;;  %v492_v38 = vsel %vm468_vm2, %v490_v42, %v491_v0 }
  0xc4   :  { %1007 = vmatmul.mubr.bf16.gmra.mrb[28].mxu1 %v378_v2  ;;  %1628 = vmatprep.mubr.bf16.mxu0 %v471_v12 }
  0xc5   :  { %1640 = vmatprep.mubr.bf16.mxu1 %v489_v57 }
  0xcb   :  { %1629 = vmatmul.mubr.bf16.vlgmr.msra.gmra.mrb[32].mxu0 %v474_v61 }
  0xcc   :  { %1641 = vmatmul.mubr.bf16.vlgmr.msra.gmra.mrb[32].mxu1 %v492_v38  ;;  %1632 = vmatprep.mubr.bf16.mxu0 %v477_v58 }
  0xcd   :  { %1645 = vmatpush3.bf16.msra.mxu1 %v1714_v4  ;;  %1648 = vmatprep.mubr.msk.bf16.mxu1 %vm1746_vm5, %v1744_v55 }
  0xce   :  { %1646 = vmatprep.subr.bf16.mxu1 %v1744_v55 }
  0xd1   :  { %1647 = vmatpush3.bf16.msra.mxu1 %v1715_v8 }
  0xd3   :  { %1633 = vmatmul.mubr.bf16.gmra.mrb[36].mxu0 %v480_v7 }
  0xd4   :  { %1636 = vmatprep.mubr.bf16.mxu0 %v483_v27 }
  0xdb   :  { %1637 = vmatmul.mubr.bf16.gmra.mrb[40].mxu0 %v486_v22 }
 0x15e   :  { %v1481_v28 = vpop.f32.mrb[0].mxu0 }
 0x15f   :  { %v1545_v43 = vpop.f32.mrb[0].mxu1  ;;  %v1482_v63 = vpop.f32.mrb[1].mxu0 }
 0x160   :  { %v1483_v9 = vadd.f32 %v1482_v63, %v1481_v28  ;;  %v1546_v23 = vpop.f32.mrb[1].mxu1  ;;  %v1484_v24 = vpop.f32.mrb[2].mxu0 }
 0x161   :  { %v1547_v25 = vadd.f32 %v1546_v23, %v1545_v43  ;;  %v1548_v26 = vpop.f32.mrb[2].mxu1  ;;  %v1485_v29 = vpop.f32.mrb[3].mxu0 }
 0x162   :  { %v1486_v30 = vadd.f32 %v1485_v29, %v1484_v24  ;;  %v1549_v31 = vpop.f32.mrb[3].mxu1 }
 0x163   :  { %v1550_v33 = vadd.f32 %v1549_v31, %v1548_v26  ;;  %v2260_v34 = vadd.f32 %v1547_v25, %v1483_v9 }
 0x165   :  { %v2262_v53 = vadd.f32 %v1550_v33, %v1486_v30 }
 0x166   :  { %v1487_v36 = vpop.f32.mrb[4].mxu0 }
 0x167   :  { %v1551_v37 = vpop.f32.mrb[4].mxu1  ;;  %v1488_v55 = vpop.f32.mrb[5].mxu0 }
 0x168   :  { %v1489_v39 = vadd.f32 %v1488_v55, %v1487_v36  ;;  %v1552_v40 = vpop.f32.mrb[5].mxu1  ;;  %v1490_v41 = vpop.f32.mrb[6].mxu0 }
 0x169   :  { %v1553_v45 = vadd.f32 %v1552_v40, %v1551_v37  ;;  %v1554_v46 = vpop.f32.mrb[6].mxu1  ;;  %v1491_v48 = vpop.f32.mrb[7].mxu0 }
 0x16a   :  { %v1492_v49 = vadd.f32 %v1491_v48, %v1490_v41  ;;  %v1555_v50 = vpop.f32.mrb[7].mxu1 }
 0x16b   :  { %v1556_v51 = vadd.f32 %v1555_v50, %v1554_v46  ;;  %v2264_v14 = vadd.f32 %v1553_v45, %v1489_v39 }
 0x16d   :  { %v2266_v54 = vadd.f32 %v1556_v51, %v1492_v49 }
 0x16e   :  { %v1493_v17 = vpop.f32.mrb[8].mxu0 }
 0x16f   :  { %v1557_v32 = vpop.f32.mrb[8].mxu1  ;;  %v1494_v60 = vpop.f32.mrb[9].mxu0 }
 0x170   :  { %v1495_v56 = vadd.f32 %v1494_v60, %v1493_v17  ;;  %v1558_v61 = vpop.f32.mrb[9].mxu1  ;;  %v1496_v47 = vpop.f32.mrb[10].mxu0 }
 0x171   :  { %v1559_v62 = vadd.f32 %v1558_v61, %v1557_v32  ;;  %v1560_v1 = vpop.f32.mrb[10].mxu1  ;;  %v1497_v13 = vpop.f32.mrb[11].mxu0 }
 0x172   :  { %v1498_v3 = vadd.f32 %v1497_v13, %v1496_v47  ;;  %v1561_v5 = vpop.f32.mrb[11].mxu1 }
 0x173   :  { %v1562_v6 = vadd.f32 %v1561_v5, %v1560_v1  ;;  %v2268_v10 = vadd.f32 %v1559_v62, %v1495_v56 }
 0x175   :  { %v2270_v16 = vadd.f32 %v1562_v6, %v1498_v3 }
 0x176   :  { %v1499_v59 = vpop.f32.mrb[12].mxu0 }
 0x177   :  { %v1563_v11 = vpop.f32.mrb[12].mxu1  ;;  %v1500_v2 = vpop.f32.mrb[13].mxu0 }
 0x178   :  { %v1501_v12 = vadd.f32 %v1500_v2, %v1499_v59  ;;  %v1564_v57 = vpop.f32.mrb[13].mxu1  ;;  %v1502_v0 = vpop.f32.mrb[14].mxu0 }
 0x179   :  { %v1565_v42 = vadd.f32 %v1564_v57, %v1563_v11  ;;  %v1566_v35 = vpop.f32.mrb[14].mxu1  ;;  %v1503_v52 = vpop.f32.mrb[15].mxu0 }
 0x17a   :  { %v1504_v38 = vadd.f32 %v1503_v52, %v1502_v0  ;;  %v1567_v58 = vpop.f32.mrb[15].mxu1 }
 0x17b   :  { %v1568_v18 = vadd.f32 %v1567_v58, %v1566_v35  ;;  %v2272_v20 = vadd.f32 %v1565_v42, %v1501_v12 }
 0x17d   :  { %v2274_v15 = vadd.f32 %v1568_v18, %v1504_v38 }
 0x17e   :  { %v1505_v19 = vpop.f32.mrb[16].mxu0 }
 0x17f   :  { %v1569_v7 = vpop.f32.mrb[16].mxu1  ;;  %v1506_v27 = vpop.f32.mrb[17].mxu0 }
 0x180   :  { %v1507_v44 = vadd.f32 %v1506_v27, %v1505_v19  ;;  %v1570_v21 = vpop.f32.mrb[17].mxu1  ;;  %v1508_v22 = vpop.f32.mrb[18].mxu0 }
 0x181   :  { %v1571_v4 = vadd.f32 %v1570_v21, %v1569_v7  ;;  %v1572_v8 = vpop.f32.mrb[18].mxu1  ;;  %v1509_v28 = vpop.f32.mrb[19].mxu0 }
 0x182   :  { %v1510_v43 = vadd.f32 %v1509_v28, %v1508_v22  ;;  %v1573_v63 = vpop.f32.mrb[19].mxu1 }
 0x183   :  { %v1574_v9 = vadd.f32 %v1573_v63, %v1572_v8  ;;  %v2276_v23 = vadd.f32 %v1571_v4, %v1507_v44 }
 0x185   :  { %v2278_v24 = vadd.f32 %v1574_v9, %v1510_v43 }
 0x186   :  { %v1511_v25 = vpop.f32.mrb[20].mxu0 }
 0x187   :  { %v1575_v26 = vpop.f32.mrb[20].mxu1  ;;  %v1512_v29 = vpop.f32.mrb[21].mxu0 }
 0x188   :  { %v1513_v30 = vadd.f32 %v1512_v29, %v1511_v25  ;;  %v1576_v31 = vpop.f32.mrb[21].mxu1  ;;  %v1514_v33 = vpop.f32.mrb[22].mxu0 }
 0x189   :  { %v1577_v36 = vadd.f32 %v1576_v31, %v1575_v26  ;;  %v1578_v37 = vpop.f32.mrb[22].mxu1  ;;  %v1515_v55 = vpop.f32.mrb[23].mxu0 }
 0x18a   :  { %v1516_v39 = vadd.f32 %v1515_v55, %v1514_v33  ;;  %v1579_v40 = vpop.f32.mrb[23].mxu1 }
 0x18b   :  { %v1580_v41 = vadd.f32 %v1579_v40, %v1578_v37  ;;  %v2280_v45 = vadd.f32 %v1577_v36, %v1513_v30 }
 0x18d   :  { %v2282_v46 = vadd.f32 %v1580_v41, %v1516_v39 }
 0x18e   :  { %v1517_v48 = vpop.f32.mrb[24].mxu0 }
 0x18f   :  { %v1581_v49 = vpop.f32.mrb[24].mxu1  ;;  %v1518_v50 = vpop.f32.mrb[25].mxu0 }
 0x190   :  { %v1519_v51 = vadd.f32 %v1518_v50, %v1517_v48  ;;  %v1582_v17 = vpop.f32.mrb[25].mxu1  ;;  %v1520_v32 = vpop.f32.mrb[26].mxu0 }
 0x191   :  { %v1583_v60 = vadd.f32 %v1582_v17, %v1581_v49  ;;  %v1584_v56 = vpop.f32.mrb[26].mxu1  ;;  %v1521_v61 = vpop.f32.mrb[27].mxu0 }
 0x192   :  { %v1522_v47 = vadd.f32 %v1521_v61, %v1520_v32  ;;  %v1585_v62 = vpop.f32.mrb[27].mxu1 }
 0x193   :  { %v1586_v1 = vadd.f32 %v1585_v62, %v1584_v56  ;;  %v1001_v13 = vadd.f32 %v1583_v60, %v1519_v51 }
 0x195   :  { %v1004_v3 = vadd.f32 %v1586_v1, %v1522_v47 }
 0x196   :  { %v1523_v5 = vpop.f32.mrb[28].mxu0 }
 0x197   :  { %v1587_v6 = vpop.f32.mrb[28].mxu1  ;;  %v1524_v59 = vpop.f32.mrb[29].mxu0 }
 0x198   :  { %v1525_v11 = vadd.f32 %v1524_v59, %v1523_v5  ;;  %v1588_v2 = vpop.f32.mrb[29].mxu1  ;;  %v1526_v12 = vpop.f32.mrb[30].mxu0 }
 0x199   :  { %v1589_v57 = vadd.f32 %v1588_v2, %v1587_v6  ;;  %v1590_v0 = vpop.f32.mrb[30].mxu1  ;;  %v1527_v42 = vpop.f32.mrb[31].mxu0 }
 0x19a   :  { %v1528_v35 = vadd.f32 %v1527_v42, %v1526_v12  ;;  %v1591_v52 = vpop.f32.mrb[31].mxu1 }
 0x19b   :  { %v1592_v38 = vadd.f32 %v1591_v52, %v1590_v0  ;;  %v1009_v58 = vadd.f32 %v1589_v57, %v1525_v11 }
 0x19d   :  { %v1012_v18 = vadd.f32 %v1592_v38, %v1528_v35 }
 0x19e   :  { %v1630_v19 = vpop.f32.mrb[32].mxu0 }
 0x19f   :  { %v1058_v7 = vadd.f32 %v1630_v19, %v2264_v14  ;;  %v1642_v27 = vpop.f32.mrb[32].mxu1  ;;  %v1049_v44 = vpop.f32.mrb[33].mxu0 }
 0x1a0   :  { %v1106_v21 = vadd.f32 %v1642_v27, %v1009_v58  ;;  %v1050_v22 = vadd.f32 %v1049_v44, %v2260_v34  ;;  %v1097_v4 = vpop.f32.mrb[33].mxu1  ;;  %v1631_v8 = vpop.f32.mrb[34].mxu0 }
 0x1a1   :  { %v1098_v28 = vadd.f32 %v1097_v4, %v1001_v13  ;;  %v1061_v43 = vadd.f32 %v1631_v8, %v2266_v54  ;;  %v1643_v63 = vpop.f32.mrb[34].mxu1  ;;  %v1052_v9 = vpop.f32.mrb[35].mxu0  ;;  %v1122_v30 = vsel %vm1112_vm8, %v1058_v7, -inf }
 0x1a2   :  { %v1109_v25 = vadd.f32 %v1643_v63, %v1012_v18  ;;  %v1053_v26 = vadd.f32 %v1052_v9, %v2262_v53  ;;  %v1100_v29 = vpop.f32.mrb[35].mxu1  ;;  %v1176_v14 = vsel %vm1112_vm8, %v1106_v21, -inf  ;;  %v1113_v34 = vsel %vm1112_vm8, %v1050_v22, -inf }
 0x1a3   :  { %v1123_v31 = vsel %vm1112_vm8, %v1061_v43, -inf  ;;  %v1101_v33 = vadd.f32 %v1100_v29, %v1004_v3  ;;  %v1167_v55 = vsel %vm1112_vm8, %v1098_v28, -inf }
 0x1a4   :  { %v1124_v36 = vmax.f32 %v1122_v30, %v1123_v31  ;;  %v1177_v37 = vsel %vm1112_vm8, %v1109_v25, -inf  ;;  %v1114_v54 = vsel %vm1112_vm8, %v1053_v26, -inf }
 0x1a5   :  { %v1178_v39 = vmax.f32 %v1176_v14, %v1177_v37  ;;  %v1115_v40 = vmax.f32 %v1113_v34, %v1114_v54  ;;  %v1168_v53 = vsel %vm1112_vm8, %v1101_v33, -inf }
 0x1a6   :  { %v1125_v41 = vrot.slane %v1124_v36, 4  ;;  %v1169_v48 = vmax.f32 %v1167_v55, %v1168_v53  ;;  %v1634_v49 = vpop.f32.mrb[36].mxu0 }
 0x1a7   :  { %v1179_v50 = vrot.slane %v1178_v39, 4  ;;  %v1116_v51 = vrot.slane %v1115_v40, 4  ;;  %v1074_v17 = vadd.f32 %v1634_v49, %v2272_v20  ;;  %v1065_v32 = vpop.f32.mrb[37].mxu0 }
 0x1a8   :  { %v1126_v60 = vmax.f32 %v1124_v36, %v1125_v41  ;;  %v1170_v56 = vrot.slane %v1169_v48, 4  ;;  %v1066_v61 = vadd.f32 %v1065_v32, %v2268_v10  ;;  %v1635_v47 = vpop.f32.mrb[38].mxu0 }
 0x1a9   :  { %v1117_v62 = vmax.f32 %v1115_v40, %v1116_v51  ;;  %v1077_v1 = vadd.f32 %v1635_v47, %v2274_v15  ;;  %v1068_v13 = vpop.f32.mrb[39].mxu0  ;;  %v1180_v5 = vmax.f32 %v1178_v39, %v1179_v50  ;;  %v1140_v2 = vsel %vm1112_vm8, %v1074_v17, -inf }
 0x1aa   :  { %v1127_v3 = vrot.slane %v1126_v60, 2  ;;  %v1171_v6 = vmax.f32 %v1169_v48, %v1170_v56  ;;  %v1069_v59 = vadd.f32 %v1068_v13, %v2270_v16  ;;  %v1131_v57 = vsel %vm1112_vm8, %v1066_v61, -inf  ;;  %v2307_v16 = vld [vmem:[%s2358_s2] ss:$0 sm:$0xff]  ;;  %s1747_s2 = smov 32  }
 0x1ab   :  { %v1118_v11 = vrot.slane %v1117_v62, 2  ;;  %v1141_v20 = vsel %vm1112_vm8, %v1077_v1, -inf  ;;  %v1181_v52 = vrot.slane %v1180_v5, 2 }
 0x1ac   :  { %v1128_v12 = vmax.f32 %v1126_v60, %v1127_v3  ;;  %v1142_v0 = vmax.f32 %v1140_v2, %v1141_v20  ;;  %v1132_v10 = vsel %vm1112_vm8, %v1069_v59, -inf  ;;  %v1172_v38 = vrot.slane %v1171_v6, 2 }
 0x1ad   :  { %v1119_v42 = vmax.f32 %v1117_v62, %v1118_v11  ;;  %v1133_v35 = vmax.f32 %v1131_v57, %v1132_v10  ;;  %v1182_v25 = vmax.f32 %v1180_v5, %v1181_v52 }
 0x1ae   :  { %v1129_v15 = vrot.slane %v1128_v12, 1  ;;  %v1143_v58 = vrot.slane %v1142_v0, 4  ;;  %v1638_v18 = vpop.f32.mrb[40].mxu0  ;;  %v1173_v26 = vmax.f32 %v1171_v6, %v1172_v38 }
 0x1af   :  { %v1120_v19 = vrot.slane %v1119_v42, 1  ;;  %v1134_v7 = vrot.slane %v1133_v35, 4  ;;  %v1090_v27 = vadd.f32 %v1638_v18, %v2280_v45  ;;  %v1081_v44 = vpop.f32.mrb[41].mxu0  ;;  %v1183_v17 = vrot.slane %v1182_v25, 1 }
 0x1b0   :  { %v1130_v21 = vmax.f32 %v1128_v12, %v1129_v15  ;;  %v1144_v22 = vmax.f32 %v1142_v0, %v1143_v58  ;;  %v1082_v4 = vadd.f32 %v1081_v44, %v2276_v23  ;;  %v1639_v8 = vpop.f32.mrb[42].mxu0 }
 0x1b1   :  { %v1121_v28 = vmax.f32 %v1119_v42, %v1120_v19  ;;  %v1135_v43 = vmax.f32 %v1133_v35, %v1134_v7  ;;  %v1084_v63 = vpop.f32.mrb[43].mxu0  ;;  %v1093_v45 = vadd.f32 %v1639_v8, %v2282_v46  ;;  %v1158_v23 = vsel %vm1112_vm8, %v1090_v27, -inf }
 0x1b2   :  { %v1193_v9 = vadd.f32 %v2307_v16, %v1130_v21  ;;  %v1145_v29 = vrot.slane %v1144_v22, 2  ;;  %v1085_v31 = vadd.f32 %v1084_v63, %v2278_v24  ;;  %v1149_v36 = vsel %vm1112_vm8, %v1082_v4, -inf }
 0x1b3   :  { %v1192_v30 = vadd.f32 %v2307_v16, %v1121_v28  ;;  %v1136_v14 = vrot.slane %v1135_v43, 2  ;;  %v1159_v55 = vsel %vm1112_vm8, %v1093_v45, -inf  ;;  %v1174_v46 = vrot.slane %v1173_v26, 1 }
 0x1b4   :  { %v1201_v33 = vmax.f32 %v1193_v9, 0.0  ;;  %v1146_v34 = vmax.f32 %v1144_v22, %v1145_v29  ;;  %v1150_v39 = vsel %vm1112_vm8, %v1085_v31, -inf  ;;  %v1160_v48 = vmax.f32 %v1158_v23, %v1159_v55 }
 0x1b5   :  { %v1200_v37 = vmax.f32 %v1192_v30, 0.0  ;;  %v1137_v54 = vmax.f32 %v1135_v43, %v1136_v14  ;;  %v1151_v24 = vmax.f32 %v1149_v36, %v1150_v39  ;;  %v1175_v5 = vmax.f32 %v1173_v26, %v1174_v46 }
 0x1b6   :  { %v1209_v40 = vpack.c.bf16 %v1201_v33, %v1201_v33  ;;  %v1341_v53 = vrot.slane %v1201_v33, 7  ;;  %v1147_v41 = vrot.slane %v1146_v34, 1  ;;  %v1161_v60 = vrot.slane %v1160_v48, 4 }
 0x1b7   :  { %v1208_v49 = vpack.c.bf16 %v1200_v37, %v1200_v37  ;;  %v1138_v50 = vrot.slane %v1137_v54, 1  ;;  %v1152_v47 = vrot.slane %v1151_v24, 4  ;;  %v1184_v11 = vmax.f32 %v1182_v25, %v1183_v17 }
 0x1b8   :  { %v1236_v51 = vunpack.c.l.b16 %v1209_v40  ;;  %v1148_v32 = vmax.f32 %v1146_v34, %v1147_v41  ;;  %v1162_v13 = vmax.f32 %v1160_v48, %v1161_v60  ;;  %v1342_v3 = vsel %vm1244_vm11, %v1341_v53, %v1200_v37 }
 0x1b9   :  { %v1235_v56 = vunpack.c.l.b16 %v1208_v49  ;;  %v1139_v61 = vmax.f32 %v1137_v54, %v1138_v50  ;;  %v1153_v59 = vmax.f32 %v1151_v24, %v1152_v47  ;;  %v1198_v38 = vadd.f32 %v2307_v16, %v1175_v5 }
 0x1ba   :  { %v1243_v62 = vrot.slane %v1236_v51, 7  ;;  %v1195_v1 = vadd.f32 %v2307_v16, %v1148_v32  ;;  %v1163_v20 = vrot.slane %v1162_v13, 2  ;;  %v1199_v7 = vadd.f32 %v2307_v16, %v1184_v11 }
 0x1bb   :  { %v1194_v6 = vadd.f32 %v2307_v16, %v1139_v61  ;;  %v1154_v0 = vrot.slane %v1153_v59, 2  ;;  %v1206_v43 = vmax.f32 %v1198_v38, 0.0 }
 0x1bc   :  { %v1203_v2 = vmax.f32 %v1195_v1, 0.0  ;;  %v1245_v12 = vsel %vm1244_vm11, %v1243_v62, %v1235_v56  ;;  %v1164_v42 = vmax.f32 %v1162_v13, %v1163_v20  ;;  %v1207_v25 = vmax.f32 %v1199_v7, 0.0  ;;  %v1460_v62 = vld [vmem:[%s2360_s4] ss:$0 sm:$0xff]  ;;  %s1748_s4 = smov 96  }
 0x1bd   :  { %v1202_v57 = vmax.f32 %v1194_v6, 0.0  ;;  %v1155_v52 = vmax.f32 %v1153_v59, %v1154_v0  ;;  %v1214_v31 = vpack.c.bf16 %v1206_v43, %v1206_v43  ;;  %v1351_v40 = vrot.slane %v1206_v43, 2 }
 0x1be   :  { %v1211_v10 = vpack.c.bf16 %v1203_v2, %v1203_v2  ;;  %v1345_v18 = vrot.slane %v1203_v2, 5  ;;  %v1165_v19 = vrot.slane %v1164_v42, 1  ;;  %v1215_v34 = vpack.c.bf16 %v1207_v25, %v1207_v25 }
 0x1bf   :  { %v1210_v35 = vpack.c.bf16 %v1202_v57, %v1202_v57  ;;  %v1343_v15 = vrot.slane %v1202_v57, 6  ;;  %v1156_v44 = vrot.slane %v1155_v52, 1  ;;  %v1241_v39 = vunpack.c.l.b16 %v1214_v31 }
 0x1c0   :  { %v1238_v58 = vunpack.c.l.b16 %v1211_v10  ;;  %v1166_v22 = vmax.f32 %v1164_v42, %v1165_v19  ;;  %v1353_v41 = vrot.slane %v1207_v25, 1  ;;  %v1242_v48 = vunpack.c.l.b16 %v1215_v34 }
 0x1c1   :  { %v1237_v27 = vunpack.c.l.b16 %v1210_v35  ;;  %v1344_v21 = vsel %vm1247_vm9, %v1343_v15, %v1342_v3  ;;  %v1157_v28 = vmax.f32 %v1155_v52, %v1156_v44  ;;  %v1258_v17 = vrot.slane %v1241_v39, 2 }
 0x1c2   :  { %v1346_v4 = vsel %vm1250_vm10, %v1345_v18, %v1344_v21  ;;  %v1249_v63 = vrot.slane %v1238_v58, 5  ;;  %v1197_v9 = vadd.f32 %v2307_v16, %v1166_v22  ;;  %v1261_v60 = vrot.slane %v1242_v48, 1 }
 0x1c3   :  { %v1246_v8 = vrot.slane %v1237_v27, 6  ;;  %v1196_v26 = vadd.f32 %v2307_v16, %v1157_v28 }
 0x1c4   :  { %v1205_v30 = vmax.f32 %v1197_v9, 0.0 }
 0x1c5   :  { %v1248_v29 = vsel %vm1247_vm9, %v1246_v8, %v1245_v12  ;;  %v1204_v45 = vmax.f32 %v1196_v26, 0.0 }
 0x1c6   :  { %v1251_v14 = vsel %vm1250_vm10, %v1249_v63, %v1248_v29  ;;  %v1213_v33 = vpack.c.bf16 %v1205_v30, %v1205_v30  ;;  %v1349_v54 = vrot.slane %v1205_v30, 3 }
 0x1c7   :  { %v1212_v23 = vpack.c.bf16 %v1204_v45, %v1204_v45  ;;  %v1347_v36 = vrot.slane %v1204_v45, 4 }
 0x1c8   :  { %v1240_v37 = vunpack.c.l.b16 %v1213_v33 }
 0x1c9   :  { %v1239_v55 = vunpack.c.l.b16 %v1212_v23  ;;  %v1348_v16 = vsel %vm1253_vm12, %v1347_v36, %v1346_v4 }
 0x1ca   :  { %v1350_v53 = vsel %vm1256_vm15, %v1349_v54, %v1348_v16  ;;  %v1255_v50 = vrot.slane %v1240_v37, 3 }
 0x1cb   :  { %v1252_v49 = vrot.slane %v1239_v55, 4  ;;  %v1352_v46 = vsel %vm1259_vm13, %v1351_v40, %v1350_v53 }
 0x1cc   :  { %v1354_v24 = vsel %vm1262_vm14, %v1353_v41, %v1352_v46 }
 0x1cd   :  { %v1254_v51 = vsel %vm1253_vm12, %v1252_v49, %v1251_v14  ;;  %1355 = vrot.lane.b32.xlu1 %v1354_v24, %s1747_s2 }
 0x1ce   :  { %v1257_v32 = vsel %vm1256_vm15, %v1255_v50, %v1254_v51 }
 0x1cf   :  { %v1260_v56 = vsel %vm1259_vm13, %v1258_v17, %v1257_v32 }
 0x1d0   :  { %v1263_v61 = vsel %vm1262_vm14, %v1261_v60, %v1260_v56 }
 0x1d1   :  { %v1264_v47 = vpack.c.b16 %v1263_v61, %v1263_v61 }
 0x1d3   :  { %1649 = vmatmul.mubr.msk.bf16.vlgmr.msra.gmra.mrb[36].mxu1 %vm1112_vm8, %v1264_v47 }
 0x23f   :  { %v1356_v0 = vpop.permute.xlu1 %1355 }
 0x2a6   :  { %v1314_v1 = vpop.f32.mrb[36].mxu1 }
 0x2a7   :  { %v1315_v13 = vadd.f32 %v1460_v62, %v1314_v1  ;;  %v1650_v3 = vpop.f32.mrb[37].mxu1 }
 0x2a8   :  { %v1317_v5 = vpop.f32.mrb[38].mxu1 }
 0x2a9   :  { %v1320_v6 = vmax.f32 %v1315_v13, 0.0  ;;  %v1651_v59 = vpop.f32.mrb[39].mxu1  ;;  %v1464_v11 = vmul.f32 -1.442695, %v1315_v13 }
 0x2ab   :  { %1328 = vrot.lane.b32.xlu0 %v1320_v6, %s1747_s2  ;;  %1716 = vpow2.f32 %v1464_v11 }
 0x2b5   :  { %v1717_v2 = vpop.eup %1716 }
 0x2b6   :  { %v1324_v20 = vadd.f32 1.0, %v1717_v2 }
 0x2b8   :  { %1718 = vrcp.f32 %v1324_v20 }
 0x2c2   :  { %v1719_v12 = vpop.eup %1718 }
 0x2c3   :  { %v1332_v57 = vsub.f32 1.0, %v1719_v12 }
 0x2c5   :  { %v1358_v42 = vmul.f32 %v1356_v0, %v1332_v57 }
 0x31d   :  { %v1329_v10 = vpop.permute.xlu0 %1328 }
 0x31e   :  { %v1331_v35 = vmul.f32 %v1719_v12, %v1329_v10 }
 0x320   :  { %v1359_v15 = vadd.f32 %v1358_v42, %v1331_v35 }
 0x322   :  { %1361 = vrot.lane.b32.xlu0 %v1359_v15, %s1748_s4 }
 0x394   :  { %v1362_v52 = vpop.permute.xlu0 %1361 }
 0x395   :  { %1364 = vst.msk [vmem:[#allocation2] sm:$0xff] %vm1112_vm8, %v1362_v52 }
 0x396   :  { %1731 = shalt.err (!%p1728_p4)
}
 0x397   :  { %s1732_s7 = scalar_lea.hbm %s2361_s5, 128 }
 0x398   :  { %p1733_p5 = scmp.ne.s32.totalorder %s2361_s5, %s1732_s7  ;;  %p1736_p6 = scmp.lt.u32.totalorder %s1732_s7, %s2361_s5 }
 0x39a   :  { %p1738_p7 = pnand %p1736_p6, %p1733_p5 }
 0x39c   :  { %1741 = shalt.err (!%p1738_p7)
}
 0x39d   :  { %1374 = dma.vmem_to_hbm [thread:$0]  %s1372_s28, 128, %s2361_s5, [#allocation3]  }
 0x39e   :  { %1742 = dma.done.wait [#allocation3], 128  }
 0x39f   :  { %1743 = vsyncadd [#allocation3], 4294967168 }
 0x3a0   :  { %1378 = vsyncpa [#allocation3], 1 }

</bundles_post_ra>
